<compile_context>
chip_gen: v5e
topology: v5e:2x2
jax: 0.10.0
libtpu: 0.0.40
codegen_flags: <defaults>
</compile_context>

<pallas_src>
import jax
import jax.numpy as jnp
from jax.experimental import pallas as pl
from jax.experimental.pallas import tpu as pltpu

_LANE = 128
_SUBLANE = 8


def _round_up(n, m):
    return (n + m - 1) // m * m


def _build_kernel(in_dim, in_pad, out_dim, out_pad, dot_dtype):
    """Build the fused MLP kernel, closing over the static feature dims."""
    pad_in = in_dim != in_pad
    pad_out = out_dim != out_pad

    def kernel(x_ref, w1_ref, b1_ref, w2_ref, b2_ref, w3_ref, b3_ref, o_ref,
               *scratch):
        if pad_in:
            # Lane-dense first-dot operand: zero the (tb, in_pad) scratch and
            # drop the narrow x tile into its first in_dim lanes.  Re-zeroed
            # every step so it is correct regardless of megacore grid sharding.
            xs_ref = scratch[0]
            xs_ref[...] = jnp.zeros_like(xs_ref)
            xs_ref[:, :in_dim] = x_ref[...].astype(xs_ref.dtype)
            x = xs_ref[...].astype(dot_dtype)
        else:
            x = x_ref[...].astype(dot_dtype)

        h1 = jnp.dot(x, w1_ref[...], preferred_element_type=jnp.float32)
        h1 = jnp.maximum(h1 + b1_ref[...], 0.0)

        h2 = jnp.dot(h1.astype(dot_dtype), w2_ref[...],
                     preferred_element_type=jnp.float32)
        h2 = jnp.maximum(h2 + b2_ref[...], 0.0)

        out = jnp.dot(h2.astype(dot_dtype), w3_ref[...],
                      preferred_element_type=jnp.float32)
        if pad_out:
            out = out[:, :out_dim]          # drop zero-padded output lanes
        o_ref[...] = (out + b3_ref[...]).astype(o_ref.dtype)

    return kernel


def prepare_params(params, *, use_bf16=True):
    """One-time parameter prep (hoisted out of the per-call forward).

    Accepts w1 (in,128), w2 (128,128), w3 (128,out) and biases of shape
    (dim,) or (1,dim).  Zero-pads w1's K dim and w3's N dim to 128 lanes and
    casts weights to bf16 (optional), so the forward wrapper emits no extra
    XLA pad/convert ops per call.
    """
    w_dtype = jnp.bfloat16 if use_bf16 else jnp.float32

    w1 = jnp.asarray(params["w1"], jnp.float32)
    w2 = jnp.asarray(params["w2"], jnp.float32)
    w3 = jnp.asarray(params["w3"], jnp.float32)
    b1 = jnp.asarray(params["b1"], jnp.float32).reshape(1, -1)
    b2 = jnp.asarray(params["b2"], jnp.float32).reshape(1, -1)
    b3 = jnp.asarray(params["b3"], jnp.float32).reshape(1, -1)

    in_dim, hidden = w1.shape
    out_dim = w3.shape[1]
    in_pad = _round_up(in_dim, _LANE)
    out_pad = _round_up(out_dim, _LANE)

    w1_p = (jnp.zeros((in_pad, hidden), jnp.float32)
            .at[:in_dim].set(w1).astype(w_dtype))
    w2_p = w2.astype(w_dtype)
    w3_p = (jnp.zeros((hidden, out_pad), jnp.float32)
            .at[:, :out_dim].set(w3).astype(w_dtype))

    return {"w1": w1_p, "b1": b1, "w2": w2_p, "b2": b2, "w3": w3_p, "b3": b3}


def qnetwork_forward(x, prepared, *, tile_batch=1024):
    """Fused 3-layer MLP forward on TPU.

    x: (batch, in_dim) float32 (or bf16 if the producer already emits bf16)
    prepared: output of prepare_params().
    """
    w1, b1 = prepared["w1"], prepared["b1"]
    w2, b2 = prepared["w2"], prepared["b2"]
    w3, b3 = prepared["w3"], prepared["b3"]

    batch, in_dim = x.shape
    in_pad, hidden = w1.shape
    out_pad = w3.shape[1]
    out_dim = b3.shape[1]
    dot_dtype = w1.dtype

    # Batch padded only to 8 sublanes; grid is ragged via cdiv.
    batch_pad = _round_up(batch, _SUBLANE)
    tb = min(_round_up(tile_batch, _SUBLANE), batch_pad)
    if batch_pad > _SUBLANE:
        # Ensure >=2 grid steps so v7x's 2 TensorCores both get work.
        tb = min(tb, _round_up(pl.cdiv(batch_pad, 2), _SUBLANE))
    grid = (pl.cdiv(batch_pad, tb),)

    x_p = x if batch == batch_pad else (
        jnp.zeros((batch_pad, in_dim), x.dtype).at[:batch].set(x))

    # Streamed batch tiles; all weights/biases resident in VMEM (constant
    # index_map -> re-DMA elided across grid steps).
    in_specs = [
        pl.BlockSpec((tb, in_dim), lambda i: (i, 0)),        # x tile (narrow)
        pl.BlockSpec((in_pad, hidden), lambda i: (0, 0)),    # w1 (resident)
        pl.BlockSpec((1, hidden), lambda i: (0, 0)),         # b1
        pl.BlockSpec((hidden, hidden), lambda i: (0, 0)),    # w2
        pl.BlockSpec((1, hidden), lambda i: (0, 0)),         # b2
        pl.BlockSpec((hidden, out_pad), lambda i: (0, 0)),   # w3
        pl.BlockSpec((1, out_dim), lambda i: (0, 0)),        # b3
    ]
    out_specs = pl.BlockSpec((tb, out_dim), lambda i: (i, 0))

    scratch_shapes = []
    if in_dim != in_pad:
        scratch_shapes.append(pltpu.VMEM((tb, in_pad), jnp.float32))

    kernel = _build_kernel(in_dim, in_pad, out_dim, out_pad, dot_dtype)

    w_bytes = w1.dtype.itemsize
    flops = 2 * batch_pad * (in_pad * hidden + hidden * hidden + hidden * out_pad)
    bytes_accessed = (
        x.dtype.itemsize * batch_pad * in_dim                       # x read
        + 4 * batch_pad * out_dim                                   # out write
        + w_bytes * (in_pad * hidden + hidden * hidden + hidden * out_pad)
        + 4 * (2 * hidden + out_dim)                                # biases
    )

    out_p = pl.pallas_call(
        kernel,
        out_shape=jax.ShapeDtypeStruct((batch_pad, out_dim), jnp.float32),
        grid=grid,
        in_specs=in_specs,
        out_specs=out_specs,
        scratch_shapes=tuple(scratch_shapes),
        compiler_params=pltpu.CompilerParams(
            dimension_semantics=("parallel",),
            # Default tb<=2048 stays far below every generation's scoped VMEM
            # default; set vmem_limit_bytes explicitly if tile_batch is pushed
            # past ~4-8K rows on v7x.
        ),
        cost_estimate=pl.CostEstimate(
            flops=flops, transcendentals=0, bytes_accessed=bytes_accessed),
    )(x_p, w1, b1, w2, b2, w3, b3)

    return out_p if batch == batch_pad else out_p[:batch]


def init_params(key, input_dim, output_dim, hidden=128):
    """Deterministic synthetic parameter init (Kaiming-uniform-ish like torch)."""
    ks = jax.random.split(key, 6)

    def linear(kw, kb, fan_in, fan_out):
        bound = 1.0 / jnp.sqrt(fan_in)
        w = jax.random.uniform(kw, (fan_in, fan_out), jnp.float32, -bound, bound)
        b = jax.random.uniform(kb, (1, fan_out), jnp.float32, -bound, bound)
        return w, b

    w1, b1 = linear(ks[0], ks[1], input_dim, hidden)
    w2, b2 = linear(ks[2], ks[3], hidden, hidden)
    w3, b3 = linear(ks[4], ks[5], hidden, output_dim)
    return {"w1": w1, "b1": b1, "w2": w2, "b2": b2, "w3": w3, "b3": b3}


def reference_forward(x, p):
    h1 = jnp.maximum(x @ p["w1"] + p["b1"], 0.0)
    h2 = jnp.maximum(h1 @ p["w2"] + p["b2"], 0.0)
    return h2 @ p["w3"] + p["b3"]


if __name__ == "__main__":
    key = jax.random.PRNGKey(0)
    k_param, k_x, k_xl = jax.random.split(key, 3)

    batch, input_dim, output_dim = 2, 8, 4
    params = init_params(k_param, input_dim, output_dim)
    x = jax.random.normal(k_x, (batch, input_dim), jnp.float32)
    ref = reference_forward(x, params)

    # 1) Exact-numerics path (f32 MXU inputs): verifies the narrow-block /
    #    in-VMEM padding layout plumbing against the f32 reference.
    prep_f32 = prepare_params(params, use_bf16=False)
    out_f32 = jax.block_until_ready(qnetwork_forward(x, prep_f32))
    assert out_f32.shape == (batch, output_dim)
    assert jnp.allclose(out_f32, ref, atol=1e-5, rtol=1e-5), "f32 path mismatch"

    # 2) Performance path (bf16 MXU inputs, f32 accumulation): relaxed tolerance.
    prep_bf16 = prepare_params(params, use_bf16=True)
    out_bf16 = jax.block_until_ready(qnetwork_forward(x, prep_bf16))
    assert out_bf16.shape == (batch, output_dim)
    assert jnp.allclose(out_bf16, ref, atol=2e-2, rtol=2e-2), "bf16 path mismatch"

    # 3) Larger "training" batch exercising the multi-tile ragged (cdiv) grid
    #    and the >=2-step split for v7x megacore.
    x_large = jax.random.normal(k_xl, (1027, input_dim), jnp.float32)
    out_large = jax.block_until_ready(qnetwork_forward(x_large, prep_bf16))
    ref_large = reference_forward(x_large, params)
    assert out_large.shape == (1027, output_dim)
    assert jnp.allclose(out_large, ref_large, atol=2e-2, rtol=2e-2), "large-batch mismatch"

    print("KERNEL_OK")
</pallas_src>

<mosaic_0001>
module attributes {stable_mosaic.version = 11 : i64} {
  func.func @kernel(%arg0: i32, %arg1: memref<8x8xf32, #tpu.memory_space<vmem>>, %arg2: memref<128x128xf32, #tpu.memory_space<vmem>>, %arg3: memref<1x128xf32, #tpu.memory_space<vmem>>, %arg4: memref<128x128xf32, #tpu.memory_space<vmem>>, %arg5: memref<1x128xf32, #tpu.memory_space<vmem>>, %arg6: memref<128x128xf32, #tpu.memory_space<vmem>>, %arg7: memref<1x4xf32, #tpu.memory_space<vmem>>, %arg8: memref<8x4xf32, #tpu.memory_space<vmem>>, %arg9: memref<8x128xf32, #tpu.memory_space<vmem>>) attributes {dimension_semantics = [#tpu.dimension_semantics<parallel>], iteration_bounds = array<i64: 1>, scalar_prefetch = 0 : i64, scratch_operands = 1 : i64, tpu.core_type = #tpu.core_type<tc>, window_params = [{transform_indices = @transform_0, window_bounds = array<i64: 8, 8>}, {pipeline_mode = #tpu.pipeline_mode<synchronous>, transform_indices = @transform_1, window_bounds = array<i64: 128, 128>}, {pipeline_mode = #tpu.pipeline_mode<synchronous>, transform_indices = @transform_2, window_bounds = array<i64: 1, 128>}, {pipeline_mode = #tpu.pipeline_mode<synchronous>, transform_indices = @transform_3, window_bounds = array<i64: 128, 128>}, {pipeline_mode = #tpu.pipeline_mode<synchronous>, transform_indices = @transform_4, window_bounds = array<i64: 1, 128>}, {pipeline_mode = #tpu.pipeline_mode<synchronous>, transform_indices = @transform_5, window_bounds = array<i64: 128, 128>}, {pipeline_mode = #tpu.pipeline_mode<synchronous>, transform_indices = @transform_6, window_bounds = array<i64: 1, 4>}, {transform_indices = @transform_7, window_bounds = array<i64: 8, 4>}]} {
    %cst = arith.constant 0.000000e+00 : f32
    %0 = vector.broadcast %cst : f32 to vector<8x128xf32>
    %c0 = arith.constant 0 : index
    %c0_0 = arith.constant 0 : index
    %1 = vector.load %arg9[%c0, %c0_0] : memref<8x128xf32, #tpu.memory_space<vmem>>, vector<8x128xf32>
    tpu.vector_store %arg9[%c0, %c0_0], %0 {strides = array<i32>} : memref<8x128xf32, #tpu.memory_space<vmem>>, vector<8x128xf32>,
    %c0_1 = arith.constant 0 : index
    %c0_2 = arith.constant 0 : index
    %2 = vector.load %arg1[%c0_1, %c0_2] : memref<8x8xf32, #tpu.memory_space<vmem>>, vector<8x8xf32>
    %c0_3 = arith.constant 0 : index
    %c0_4 = arith.constant 0 : index
    %3 = vector.load %arg9[%c0_3, %c0_4] : memref<8x128xf32, #tpu.memory_space<vmem>>, vector<8x8xf32>
    tpu.vector_store %arg9[%c0_3, %c0_4], %2 {strides = array<i32>} : memref<8x128xf32, #tpu.memory_space<vmem>>, vector<8x8xf32>,
    %c0_5 = arith.constant 0 : index
    %c0_6 = arith.constant 0 : index
    %4 = vector.load %arg9[%c0_5, %c0_6] : memref<8x128xf32, #tpu.memory_space<vmem>>, vector<8x128xf32>
    %c0_7 = arith.constant 0 : index
    %c0_8 = arith.constant 0 : index
    %5 = vector.load %arg2[%c0_7, %c0_8] : memref<128x128xf32, #tpu.memory_space<vmem>>, vector<128x128xf32>
    %cst_9 = arith.constant dense<0.000000e+00> : vector<8x128xf32>
    %6 = tpu.matmul %4, %5, %cst_9 {dimension_numbers = #tpu.dot_dimension_numbers<[1], [0], [0], [1], [0, 0, 1, 1], [], []>} : vector<8x128xf32>, vector<128x128xf32>, vector<8x128xf32> -> vector<8x128xf32>
    %c0_10 = arith.constant 0 : index
    %c0_11 = arith.constant 0 : index
    %7 = vector.load %arg3[%c0_10, %c0_11] : memref<1x128xf32, #tpu.memory_space<vmem>>, vector<1x128xf32>
    %8 = vector.broadcast %7 : vector<1x128xf32> to vector<8x128xf32>
    %9 = arith.addf %6, %8 : vector<8x128xf32>
    %cst_12 = arith.constant 0.000000e+00 : f32
    %10 = vector.broadcast %cst_12 : f32 to vector<8x128xf32>
    %11 = arith.maximumf %9, %10 : vector<8x128xf32>
    %c0_13 = arith.constant 0 : index
    %c0_14 = arith.constant 0 : index
    %12 = vector.load %arg4[%c0_13, %c0_14] : memref<128x128xf32, #tpu.memory_space<vmem>>, vector<128x128xf32>
    %cst_15 = arith.constant dense<0.000000e+00> : vector<8x128xf32>
    %13 = tpu.matmul %11, %12, %cst_15 {dimension_numbers = #tpu.dot_dimension_numbers<[1], [0], [0], [1], [0, 0, 1, 1], [], []>} : vector<8x128xf32>, vector<128x128xf32>, vector<8x128xf32> -> vector<8x128xf32>
    %c0_16 = arith.constant 0 : index
    %c0_17 = arith.constant 0 : index
    %14 = vector.load %arg5[%c0_16, %c0_17] : memref<1x128xf32, #tpu.memory_space<vmem>>, vector<1x128xf32>
    %15 = vector.broadcast %14 : vector<1x128xf32> to vector<8x128xf32>
    %16 = arith.addf %13, %15 : vector<8x128xf32>
    %cst_18 = arith.constant 0.000000e+00 : f32
    %17 = vector.broadcast %cst_18 : f32 to vector<8x128xf32>
    %18 = arith.maximumf %16, %17 : vector<8x128xf32>
    %c0_19 = arith.constant 0 : index
    %c0_20 = arith.constant 0 : index
    %19 = vector.load %arg6[%c0_19, %c0_20] : memref<128x128xf32, #tpu.memory_space<vmem>>, vector<128x128xf32>
    %cst_21 = arith.constant dense<0.000000e+00> : vector<8x128xf32>
    %20 = tpu.matmul %18, %19, %cst_21 {dimension_numbers = #tpu.dot_dimension_numbers<[1], [0], [0], [1], [0, 0, 1, 1], [], []>} : vector<8x128xf32>, vector<128x128xf32>, vector<8x128xf32> -> vector<8x128xf32>
    %21 = vector.extract_strided_slice %20 {offsets = [0, 0], sizes = [8, 4], strides = [1, 1]} : vector<8x128xf32> to vector<8x4xf32>
    %c0_22 = arith.constant 0 : index
    %c0_23 = arith.constant 0 : index
    %22 = vector.load %arg7[%c0_22, %c0_23] : memref<1x4xf32, #tpu.memory_space<vmem>>, vector<1x4xf32>
    %23 = vector.broadcast %22 : vector<1x4xf32> to vector<8x4xf32>
    %24 = arith.addf %21, %23 : vector<8x4xf32>
    %c0_24 = arith.constant 0 : index
    %c0_25 = arith.constant 0 : index
    %25 = vector.load %arg8[%c0_24, %c0_25] : memref<8x4xf32, #tpu.memory_space<vmem>>, vector<8x4xf32>
    tpu.vector_store %arg8[%c0_24, %c0_25], %24 {strides = array<i32>} : memref<8x4xf32, #tpu.memory_space<vmem>>, vector<8x4xf32>,
    return
  }
  func.func @transform_0(%arg0: i32) -> (i32, i32) {
    %c0_i32 = arith.constant 0 : i32
    %c0_i32_0 = arith.constant 0 : i32
    return %arg0, %c0_i32 : i32, i32
  }
  func.func @transform_1(%arg0: i32) -> (i32, i32) {
    %c0_i32 = arith.constant 0 : i32
    %c0_i32_0 = arith.constant 0 : i32
    %c0_i32_1 = arith.constant 0 : i32
    return %c0_i32, %c0_i32_0 : i32, i32
  }
  func.func @transform_2(%arg0: i32) -> (i32, i32) {
    %c0_i32 = arith.constant 0 : i32
    %c0_i32_0 = arith.constant 0 : i32
    %c0_i32_1 = arith.constant 0 : i32
    return %c0_i32, %c0_i32_0 : i32, i32
  }
  func.func @transform_3(%arg0: i32) -> (i32, i32) {
    %c0_i32 = arith.constant 0 : i32
    %c0_i32_0 = arith.constant 0 : i32
    %c0_i32_1 = arith.constant 0 : i32
    return %c0_i32, %c0_i32_0 : i32, i32
  }
  func.func @transform_4(%arg0: i32) -> (i32, i32) {
    %c0_i32 = arith.constant 0 : i32
    %c0_i32_0 = arith.constant 0 : i32
    %c0_i32_1 = arith.constant 0 : i32
    return %c0_i32, %c0_i32_0 : i32, i32
  }
  func.func @transform_5(%arg0: i32) -> (i32, i32) {
    %c0_i32 = arith.constant 0 : i32
    %c0_i32_0 = arith.constant 0 : i32
    %c0_i32_1 = arith.constant 0 : i32
    return %c0_i32, %c0_i32_0 : i32, i32
  }
  func.func @transform_6(%arg0: i32) -> (i32, i32) {
    %c0_i32 = arith.constant 0 : i32
    %c0_i32_0 = arith.constant 0 : i32
    %c0_i32_1 = arith.constant 0 : i32
    return %c0_i32, %c0_i32_0 : i32, i32
  }
  func.func @transform_7(%arg0: i32) -> (i32, i32) {
    %c0_i32 = arith.constant 0 : i32
    %c0_i32_0 = arith.constant 0 : i32
    return %arg0, %c0_i32 : i32, i32
  }
}

</mosaic_0001>

<bundles_post_ra>
// kernel: tpu_custom_call.1
= control target key start
LH: loop header
LB: loop body
LE: loop exit
PB: predicated region body
PF: predicated region fallthrough
CT: control target
= control target key end

     0   :  { %12 = vsyncpa [#allocation4], 0  ;;  %s407_s0 = inlined_call_operand.hbm [shape: f32[8,8], index: 0, kind: input, shape index: {}]   ;;  %s408_s1 = inlined_call_operand.hbm [shape: f32[128,128], index: 1, kind: input, shape index: {}]   ;;  %s409_s2 = inlined_call_operand.vmem [shape: f32[1,128], index: 2, kind: input, shape index: {}]   ;;  %s410_s3 = inlined_call_operand.hbm [shape: f32[128,128], index: 3, kind: input, shape index: {}]   ;;  %s411_s4 = inlined_call_operand.vmem [shape: f32[1,128], index: 4, kind: input, shape index: {}]   ;;  %s412_s5 = inlined_call_operand.hbm [shape: f32[128,128], index: 5, kind: input, shape index: {}]   ;;  %s413_s6 = inlined_call_operand.vmem [shape: f32[1,4], index: 6, kind: input, shape index: {}]   ;;  %s414_s7 = inlined_call_operand.vmem [shape: f32[8,4], index: 7, kind: output, shape index: {}]  }
   0x1   :  { %13 = vsyncpa [#allocation6], 0  ;;  %s30_s26 = sshll.u32 %s408_s1, 4  ;;  %s31_s26 = int_to_ptr.hbm [resolvable:$true] %s30_s26 }
   0x2   :  { %14 = vsyncpa [#allocation9], 0  ;;  %s336_s27 = smov [#allocation5]   ;;  %s20_s8 = sshll.u32 %s407_s0, 4  ;;  %s21_s8 = int_to_ptr.hbm [resolvable:$true] %s20_s8 }
   0x3   :  { %s32_s28 = sshll.u32 %s336_s27, 4  ;;  %s337_s9 = smov 128   ;;  %s33_s28 = int_to_ptr.vmem [resolvable:$true] %s32_s28 }
   0x4   :  { %s338_s10 = smov 8   ;;  %s339_s11 = smov [#allocation3]  }
   0x5   :  { %38 = dma.hbm_to_vmem [thread:$0]  %s31_s26, 2048, %s33_s28, [#allocation6], %s337_s9, %s337_s9, %s338_s10  }
   0x6   :  { %s22_s12 = sshll.u32 %s339_s11, 4  ;;  %s45_s15 = sshll.u32 %s410_s3, 4  ;;  %s23_s12 = int_to_ptr.vmem [resolvable:$true] %s22_s12  ;;  %s46_s15 = int_to_ptr.hbm [resolvable:$true] %s45_s15 }
   0x7   :  { %25 = dma.hbm_to_vmem [thread:$0]  %s21_s8, 128, %s23_s12, [#allocation4]  }
   0x8   :  { %s60_s17 = sshll.u32 %s412_s5, 4  ;;  %s340_s18 = smov [#allocation7]   ;;  %s61_s17 = int_to_ptr.hbm [resolvable:$true] %s60_s17 }
   0x9   :  { %s47_s19 = sshll.u32 %s340_s18, 4  ;;  %s341_s0 = smov [#allocation8]   ;;  %s48_s19 = int_to_ptr.vmem [resolvable:$true] %s47_s19 }
   0xa   :  { %53 = dma.hbm_to_vmem [thread:$0]  %s46_s15, 2048, %s48_s19, [#allocation6], %s337_s9, %s337_s9, %s338_s10  }
   0xb   :  { %s62_s20 = sshll.u32 %s341_s0, 4  ;;  %s63_s20 = int_to_ptr.vmem [resolvable:$true] %s62_s20 }
   0xc   :  { %68 = dma.hbm_to_vmem [thread:$0]  %s61_s17, 2048, %s63_s20, [#allocation9], %s337_s9, %s337_s9, %s338_s10  }
   0xd   :  { %330 = dma.done.wait [#allocation4], 128  }
   0xe   :  { %331 = vsyncadd [#allocation4], 4294967168 }
   0xf   :  { %332 = dma.done.wait [#allocation6], 4096  }
  0x10   :  { %333 = vsyncadd [#allocation6], 4294963200 }
  0x11   :  { %334 = dma.done.wait [#allocation9], 2048  }
  0x12   :  { %335 = vsyncadd [#allocation9], 4294965248  ;;  %v342_v0 = vmov 0.0   ;;  %v107_v1 = vld [vmem:[#allocation5 + $0x78] sm:$0xff]  ;;  %v106_v2 = vld [vmem:[#allocation5 + $0x70] sm:$0xff]  ;;  %vm89_vm0 = vcmask 64512  }
  0x13   :  { %87 = vst [vmem:[#allocation2] sm:$0xff] %v342_v0  ;;  %112 = vmatpush.msra.mxu0 %v107_v1  ;;  %v105_v3 = vld [vmem:[#allocation5 + $0x68] sm:$0xff]  ;;  %v104_v4 = vld [vmem:[#allocation5 + $0x60] sm:$0xff]  ;;  %v88_v5 = vld [vmem:[#allocation3] sm:$0xff]  ;;  %vm215_vm1 = vcmask 31744  }
  0x14   :  { %v148_v6 = vld [vmem:[#allocation7 + $0x78] sm:$0xff]  ;;  %90 = vst.msk [vmem:[#allocation2] sm:$0xff] %vm89_vm0, %v88_v5  ;;  %v147_v8 = vld [vmem:[#allocation7 + $0x70] sm:$0xff]  ;;  %v146_v9 = vld [vmem:[#allocation7 + $0x68] sm:$0xff] }
  0x15   :  { %113 = vmatpush.msra.mxu0 %v106_v2  ;;  %v103_v7 = vld [vmem:[#allocation5 + $0x58] sm:$0xff]  ;;  %153 = vmatpush.msra.mxu1 %v148_v6  ;;  %v102_v10 = vld [vmem:[#allocation5 + $0x50] sm:$0xff]  ;;  %v145_v11 = vld [vmem:[#allocation7 + $0x60] sm:$0xff] }
  0x16   :  { %v101_v12 = vld [vmem:[#allocation5 + $0x48] sm:$0xff]  ;;  %v144_v13 = vld [vmem:[#allocation7 + $0x58] sm:$0xff]  ;;  %v100_v14 = vld [vmem:[#allocation5 + $0x40] sm:$0xff] }
  0x17   :  { %114 = vmatpush.msra.mxu0 %v105_v3  ;;  %154 = vmatpush.msra.mxu1 %v147_v8  ;;  %v143_v15 = vld [vmem:[#allocation7 + $0x50] sm:$0xff]  ;;  %v99_v16 = vld [vmem:[#allocation5 + $0x38] sm:$0xff]  ;;  %v142_v17 = vld [vmem:[#allocation7 + $0x48] sm:$0xff] }
  0x18   :  { %v98_v18 = vld [vmem:[#allocation5 + $0x30] sm:$0xff]  ;;  %v141_v19 = vld [vmem:[#allocation7 + $0x40] sm:$0xff]  ;;  %v97_v20 = vld [vmem:[#allocation5 + $0x28] sm:$0xff] }
  0x19   :  { %115 = vmatpush.msra.mxu0 %v104_v4  ;;  %155 = vmatpush.msra.mxu1 %v146_v9  ;;  %v140_v21 = vld [vmem:[#allocation7 + $0x38] sm:$0xff]  ;;  %v96_v22 = vld [vmem:[#allocation5 + $0x20] sm:$0xff]  ;;  %v139_v23 = vld [vmem:[#allocation7 + $0x30] sm:$0xff] }
  0x1a   :  { %v95_v24 = vld [vmem:[#allocation5 + $0x18] sm:$0xff]  ;;  %v138_v25 = vld [vmem:[#allocation7 + $0x28] sm:$0xff]  ;;  %v94_v26 = vld [vmem:[#allocation5 + $0x10] sm:$0xff] }
  0x1b   :  { %116 = vmatpush.msra.mxu0 %v103_v7  ;;  %156 = vmatpush.msra.mxu1 %v145_v11  ;;  %v137_v27 = vld [vmem:[#allocation7 + $0x20] sm:$0xff]  ;;  %v93_v28 = vld [vmem:[#allocation5 + $0x8] sm:$0xff]  ;;  %v136_v29 = vld [vmem:[#allocation7 + $0x18] sm:$0xff] }
  0x1c   :  { %v92_v30 = vld [vmem:[#allocation5] sm:$0xff]  ;;  %v91_v31 = vld [vmem:[#allocation2] sm:$0xff]  ;;  %v134_v33 = vld [vmem:[#allocation7 + $0x8] sm:$0xff] }
  0x1d   :  { %117 = vmatpush.msra.mxu0 %v102_v10  ;;  %157 = vmatpush.msra.mxu1 %v144_v13  ;;  %v135_v32 = vld [vmem:[#allocation7 + $0x10] sm:$0xff]  ;;  %v133_v34 = vld [vmem:[#allocation7] sm:$0xff]  ;;  %v189_v35 = vld [vmem:[#allocation8 + $0x78] sm:$0xff] }
  0x1e   :  { %v188_v36 = vld [vmem:[#allocation8 + $0x70] sm:$0xff]  ;;  %190 = vmatpush.msra.mxu2 %v189_v35  ;;  %v187_v37 = vld [vmem:[#allocation8 + $0x68] sm:$0xff]  ;;  %v186_v38 = vld [vmem:[#allocation8 + $0x60] sm:$0xff] }
  0x1f   :  { %118 = vmatpush.msra.mxu0 %v101_v12  ;;  %158 = vmatpush.msra.mxu1 %v143_v15  ;;  %v185_v39 = vld [vmem:[#allocation8 + $0x58] sm:$0xff]  ;;  %v184_v40 = vld [vmem:[#allocation8 + $0x50] sm:$0xff]  ;;  %v183_v41 = vld [vmem:[#allocation8 + $0x48] sm:$0xff] }
  0x20   :  { %191 = vmatpush.msra.mxu2 %v188_v36  ;;  %v182_v42 = vld [vmem:[#allocation8 + $0x40] sm:$0xff]  ;;  %v181_v43 = vld [vmem:[#allocation8 + $0x38] sm:$0xff]  ;;  %v180_v44 = vld [vmem:[#allocation8 + $0x30] sm:$0xff] }
  0x21   :  { %119 = vmatpush.msra.mxu0 %v100_v14  ;;  %159 = vmatpush.msra.mxu1 %v142_v17  ;;  %v179_v45 = vld [vmem:[#allocation8 + $0x28] sm:$0xff]  ;;  %v178_v46 = vld [vmem:[#allocation8 + $0x20] sm:$0xff]  ;;  %v177_v47 = vld [vmem:[#allocation8 + $0x18] sm:$0xff] }
  0x22   :  { %192 = vmatpush.msra.mxu2 %v187_v37  ;;  %v231_v48 = vld [vmem:[%s409_s2] ss:$0 sm:$0xff]  ;;  %v175_v53 = vld [vmem:[#allocation8 + $0x8] sm:$0xff]  ;;  %v174_v54 = vld [vmem:[#allocation8] sm:$0xff] }
  0x23   :  { %120 = vmatpush.msra.mxu0 %v99_v16  ;;  %160 = vmatpush.msra.mxu1 %v141_v19  ;;  %v176_v52 = vld [vmem:[#allocation8 + $0x10] sm:$0xff] }
  0x24   :  { %193 = vmatpush.msra.mxu2 %v186_v38  ;;  %v232_v55 = vld [vmem:[%s411_s4] ss:$0 sm:$0xff] }
  0x25   :  { %121 = vmatpush.msra.mxu0 %v98_v18  ;;  %161 = vmatpush.msra.mxu1 %v140_v21  ;;  %v233_v59 = vld [vmem:[%s413_s6] ss:$0 sm:$0xff] }
  0x26   :  { %194 = vmatpush.msra.mxu2 %v185_v39 }
  0x27   :  { %122 = vmatpush.msra.mxu0 %v97_v20  ;;  %162 = vmatpush.msra.mxu1 %v139_v23 }
  0x28   :  { %195 = vmatpush.msra.mxu2 %v184_v40 }
  0x29   :  { %123 = vmatpush.msra.mxu0 %v96_v22  ;;  %163 = vmatpush.msra.mxu1 %v138_v25 }
  0x2a   :  { %196 = vmatpush.msra.mxu2 %v183_v41 }
  0x2b   :  { %124 = vmatpush.msra.mxu0 %v95_v24  ;;  %164 = vmatpush.msra.mxu1 %v137_v27 }
  0x2c   :  { %197 = vmatpush.msra.mxu2 %v182_v42 }
  0x2d   :  { %125 = vmatpush.msra.mxu0 %v94_v26  ;;  %165 = vmatpush.msra.mxu1 %v136_v29 }
  0x2e   :  { %198 = vmatpush.msra.mxu2 %v181_v43 }
  0x2f   :  { %126 = vmatpush.msra.mxu0 %v93_v28  ;;  %166 = vmatpush.msra.mxu1 %v135_v32 }
  0x30   :  { %199 = vmatpush.msra.mxu2 %v180_v44 }
  0x31   :  { %127 = vmatpush.msra.mxu0 %v92_v30  ;;  %167 = vmatpush.msra.mxu1 %v134_v33 }
  0x32   :  { %128 = vmatmul.f32.vlgmr.msra.gmra.mxu0 %v91_v31  ;;  %200 = vmatpush.msra.mxu2 %v179_v45 }
  0x33   :  { %168 = vmatpush.msra.mxu1 %v133_v34 }
  0x34   :  { %201 = vmatpush.msra.mxu2 %v178_v46 }
  0x36   :  { %202 = vmatpush.msra.mxu2 %v177_v47 }
  0x38   :  { %203 = vmatpush.msra.mxu2 %v176_v52 }
  0x3a   :  { %204 = vmatpush.msra.mxu2 %v175_v53 }
  0x3c   :  { %205 = vmatpush.msra.mxu2 %v174_v54 }
  0xaf   :  { %v129_v49 = vpop.f32.mrf.mxu0 }
  0xb0   :  { %v130_v50 = vadd.f32 %v231_v48, %v129_v49 }
  0xb2   :  { %v132_v51 = vmax.f32 %v130_v50, 0.0 }
  0xb4   :  { %169 = vmatmul.f32.vlgmr.msra.gmra.mxu1 %v132_v51 }
 0x131   :  { %v170_v56 = vpop.f32.mrf.mxu1 }
 0x132   :  { %v171_v57 = vadd.f32 %v232_v55, %v170_v56 }
 0x134   :  { %v173_v58 = vmax.f32 %v171_v57, 0.0 }
 0x136   :  { %206 = vmatmul.f32.vlgmr.msra.gmra.mxu2 %v173_v58 }
 0x1b9   :  { %v207_v60 = vpop.f32.mrf.mxu2 }
 0x1ba   :  { %v214_v61 = vadd.f32 %v233_v59, %v207_v60 }
 0x1bc   :  { %216 = vst.msk [vmem:[%s414_s7] sm:$0xff] %vm215_vm1, %v214_v61 }
 0x1bd   :  { %221 = vsyncpa [#allocation4], 1 }
 0x1be   :  { %222 = vsyncpa [#allocation6], 1 }
 0x1bf   :  { %223 = vsyncpa [#allocation9], 1 }

</bundles_post_ra>
